<compile_context>
chip_gen: v7x
topology: tpu7x:2x2x1
jax: 0.10.0
libtpu: 0.0.40
codegen_flags: <defaults>
</compile_context>

<pallas_src>
import math

import jax
import jax.numpy as jnp
from jax.experimental import pallas as pl
from jax.experimental.pallas import tpu as pltpu

_LANE = 128
_TARGET_BLOCK_BYTES = 4 * 1024 * 1024   # ~4 MiB tiles: amortize per-step overhead
                                        # on v5e/v6e, fit v7x's 64 MiB VMEM.
_FAST_PATH_BYTES = 256 * 1024           # below this, kernel-launch fixed cost wins.
_MIN_SPLIT_BYTES = 1 * 1024 * 1024      # above this, guarantee >=2 grid programs
                                        # so both v7x TensorCores get work.


def _row_mask_kernel(mask_ref, x_ref, o_ref):
    # mask_ref: (TR, 1), x_ref / o_ref: (TR, TF).  Broadcast multiply on the
    # VPU — free filler under the HBM-bandwidth bottleneck.
    o_ref[...] = x_ref[...] * mask_ref[...]


def _round_up(v, m):
    return ((v + m - 1) // m) * m


def fake_structured_sparse_weight(x: jax.Array, mask: jax.Array) -> jax.Array:
    """Row-wise structured-sparsity masking: y = mask.reshape(-1, 1, ..., 1) * x."""
    assert mask.shape[0] == x.shape[0], "mask must match x along dim 0"
    R = x.shape[0]
    F = int(math.prod(x.shape[1:])) if x.ndim > 1 else 1
    itemsize = jnp.dtype(x.dtype).itemsize
    total_bytes = R * F * itemsize

    # --- Small-tensor fast path: let XLA fuse a single elementwise multiply. ---
    if total_bytes <= _FAST_PATH_BYTES:
        bshape = [1] * max(x.ndim, 1)
        bshape[0] = R
        return mask.reshape(bshape).astype(x.dtype) * x

    x2 = x.reshape(R, F)
    m2 = mask.astype(x.dtype).reshape(R, 1)
    sublane = {4: 8, 2: 16, 1: 32}.get(itemsize, 8)

    # --- Tile selection (no padding: Pallas masks the ragged last tile). ---
    # Feature (lane) tile: prefer the full width when one sublane-pack of
    # full-width rows fits the block budget; otherwise a big multiple of 128.
    if sublane * F * itemsize <= _TARGET_BLOCK_BYTES or F <= _LANE:
        TF = F
    else:
        TF = max(_LANE,
                 (_TARGET_BLOCK_BYTES // (sublane * itemsize)) // _LANE * _LANE)

    # Row (sublane) tile: size the block to ~_TARGET_BLOCK_BYTES, multiple of
    # the sublane pack (or the whole R when R is small).
    if R <= sublane:
        TR = R
    else:
        max_rows = max(sublane, _TARGET_BLOCK_BYTES // (TF * itemsize))
        TR = min(R, (max_rows // sublane) * sublane)

    # --- v7x: guarantee >=2 grid programs for non-tiny tensors. ---
    if (pl.cdiv(R, TR) * pl.cdiv(F, TF) == 1) and total_bytes > _MIN_SPLIT_BYTES:
        half_rows = _round_up((R + 1) // 2, sublane)
        if half_rows < R:
            TR = half_rows
        elif F > _LANE:
            half_f = _round_up((F + 1) // 2, _LANE)
            if half_f < F:
                TF = half_f

    # Feature axis innermost so the mask block index is constant across it
    # (mask block stays resident in VMEM across feature tiles).
    grid = (pl.cdiv(R, TR), pl.cdiv(F, TF))

    # Derive the VMEM limit from the actual live buffers: double-buffered x
    # and out tiles + lane-padded mask blocks + slack.  Clamp so it never
    # exceeds v7x's 64 MiB physical VMEM.
    tile_bytes = TR * TF * itemsize
    mask_block_bytes = TR * _LANE * itemsize
    vmem_limit = 2 * 2 * tile_bytes + 2 * mask_block_bytes + (4 << 20)
    vmem_limit = int(min(max(vmem_limit, 16 << 20), 48 << 20))

    out2 = pl.pallas_call(
        _row_mask_kernel,
        out_shape=jax.ShapeDtypeStruct((R, F), x.dtype),
        grid=grid,
        in_specs=[
            pl.BlockSpec((TR, 1), lambda i, j: (i, 0)),    # mask column block
            pl.BlockSpec((TR, TF), lambda i, j: (i, j)),   # x tile
        ],
        out_specs=pl.BlockSpec((TR, TF), lambda i, j: (i, j)),
        compiler_params=pltpu.CompilerParams(
            dimension_semantics=("parallel", "parallel"),
            vmem_limit_bytes=vmem_limit,
        ),
        cost_estimate=pl.CostEstimate(
            flops=R * F,
            bytes_accessed=2 * R * F * itemsize + R * itemsize,
            transcendentals=0,
        ),
    )(m2, x2)

    return out2.reshape(x.shape)


def _reference(x, mask):
    shape = [1] * x.ndim
    shape[0] = -1
    return mask.reshape(shape).astype(x.dtype) * x


if __name__ == "__main__":
    key = jax.random.PRNGKey(0)
    keys = jax.random.split(key, 8)

    cases = []

    # Tiny conv-weight-like (OIHW): fast path (fused XLA multiply).
    x1 = jax.random.normal(keys[0], (8, 4, 4, 8), dtype=jnp.float32)
    m1 = jnp.arange(x1.shape[0]) % 2 == 0
    cases.append((x1, m1))

    # Small conv weight, odd rows / ragged features: fast path.
    x2 = jax.random.normal(keys[1], (20, 3, 3, 3), dtype=jnp.float32)
    m2 = jax.random.bernoulli(keys[2], 0.5, (x2.shape[0],))
    cases.append((x2, m2))

    # Linear-like bf16 weight: fast path.
    x3 = jax.random.normal(keys[3], (32, 200), dtype=jnp.bfloat16)
    m3 = jnp.arange(x3.shape[0]) % 3 != 0
    cases.append((x3, m3))

    # Pallas path: F=700 (not a multiple of 128, no pad/slice), single-block
    # shape that gets split across rows so v7x's second TensorCore has work.
    x4 = jax.random.normal(keys[4], (512, 700), dtype=jnp.float32)
    m4 = jnp.arange(x4.shape[0]) % 2 == 1
    cases.append((x4, m4))

    # Pallas path: multiple row blocks with a ragged last row tile.
    x5 = jax.random.normal(keys[5], (4096, 800), dtype=jnp.float32)
    m5 = jax.random.bernoulli(keys[6], 0.5, (x5.shape[0],))
    cases.append((x5, m5))

    # Pallas path: bf16 (sublane pack 16), full-width feature tile.
    x6 = jax.random.normal(keys[7], (1024, 1100), dtype=jnp.bfloat16)
    m6 = jnp.arange(x6.shape[0]) % 4 != 0
    cases.append((x6, m6))

    for x, m in cases:
        y = fake_structured_sparse_weight(x, m)
        jax.block_until_ready(y)
        ref = _reference(x, m)
        assert y.shape == x.shape and y.dtype == x.dtype
        assert jnp.allclose(y.astype(jnp.float32), ref.astype(jnp.float32)), (
            f"mismatch vs. reference for shape {x.shape} dtype {x.dtype}"
        )

    print("KERNEL_OK")
</pallas_src>

<mosaic_0001>
module attributes {stable_mosaic.version = 11 : i64} {
  func.func @_row_mask_kernel(%arg0: i32, %arg1: i32, %arg2: memref<256x1xf32, #tpu.memory_space<vmem>>, %arg3: memref<256x700xf32, #tpu.memory_space<vmem>>, %arg4: memref<256x700xf32, #tpu.memory_space<vmem>>) attributes {dimension_semantics = [#tpu.dimension_semantics<parallel>, #tpu.dimension_semantics<parallel>], iteration_bounds = array<i64: 2, 1>, scalar_prefetch = 0 : i64, scratch_operands = 0 : i64, tpu.core_type = #tpu.core_type<tc>, window_params = [{transform_indices = @transform_0, window_bounds = array<i64: 256, 1>}, {transform_indices = @transform_1, window_bounds = array<i64: 256, 700>}, {transform_indices = @transform_2, window_bounds = array<i64: 256, 700>}]} {
    %c0 = arith.constant 0 : index
    %c0_0 = arith.constant 0 : index
    %0 = vector.load %arg3[%c0, %c0_0] : memref<256x700xf32, #tpu.memory_space<vmem>>, vector<256x700xf32>
    %c0_1 = arith.constant 0 : index
    %c0_2 = arith.constant 0 : index
    %1 = vector.load %arg2[%c0_1, %c0_2] : memref<256x1xf32, #tpu.memory_space<vmem>>, vector<256x1xf32>
    %2 = vector.broadcast %1 : vector<256x1xf32> to vector<256x700xf32>
    %3 = arith.mulf %0, %2 : vector<256x700xf32>
    %c0_3 = arith.constant 0 : index
    %c0_4 = arith.constant 0 : index
    %4 = vector.load %arg4[%c0_3, %c0_4] : memref<256x700xf32, #tpu.memory_space<vmem>>, vector<256x700xf32>
    tpu.vector_store %arg4[%c0_3, %c0_4], %3 {strides = array<i32>} : memref<256x700xf32, #tpu.memory_space<vmem>>, vector<256x700xf32>,
    return
  }
  func.func @transform_0(%arg0: i32, %arg1: i32) -> (i32, i32) {
    %c0_i32 = arith.constant 0 : i32
    %c0_i32_0 = arith.constant 0 : i32
    return %arg0, %c0_i32 : i32, i32
  }
  func.func @transform_1(%arg0: i32, %arg1: i32) -> (i32, i32) {
    %c0_i32 = arith.constant 0 : i32
    return %arg0, %arg1 : i32, i32
  }
  func.func @transform_2(%arg0: i32, %arg1: i32) -> (i32, i32) {
    %c0_i32 = arith.constant 0 : i32
    return %arg0, %arg1 : i32, i32
  }
}

</mosaic_0001>

<bundles_post_ra>
// kernel: tpu_custom_call.1
= control target key start
LH: loop header
LB: loop body
LE: loop exit
PB: predicated region body
PF: predicated region fallthrough
CT: control target
= control target key end

     0   :  { %s1165_s9 = smov 0   ;;  %s1167_s10 = smov 0   ;;  %s1659_s0 = inlined_call_operand.vmem [shape: f32[512,1], index: 0, kind: input, shape index: {}]   ;;  %s1660_s1 = inlined_call_operand.vmem [shape: f32[512,700], index: 1, kind: input, shape index: {}]   ;;  %s1661_s2 = inlined_call_operand.vmem [shape: f32[512,700], index: 2, kind: output, shape index: {}]  }
   0x1   :  { %s1169_s11 = smov 0  }
   0x2 LB: > { %s24_s12 = sadd.s32 1, %s1143_s10  ;;  %p1088_p0 = scmp.ge.s32.totalorder %s1147_s11, 1  ;;  %s1147_s11 = sphi %s1169_s11, %s12_s11   ;;  %s1143_s10 = sphi %s1167_s10, %s1663_s10   ;;  %s1139_s9 = sphi %s1165_s9, %s1662_s9  }
   0x3   : > { %p26_p1 = scmp.ge.s32.totalorder %s24_s12, 2  ;;  %p146_p2 = scmp.lt.s32.totalorder %s1147_s11, 3 }
   0x5   : > { %s1665_s12 = smov (%p26_p1, %s24_s12), 0  ;;  %p147_p3 = pnand %p1088_p0, %p146_p2 }
   0x6   : > { %s1089_s13 = sshll.u32 (!%p147_p3), %s1139_s9, 5  ;;  %v1149_v0 = vmov (!%p147_p3), 0   ;;  %vm794_vm0 = vcmask (!%p147_p3), 490496  }
   0x7   : > { %150 = sbr.rel (%p147_p3) target bundleno = 244 (0xf4), region = 28  ;;  %1124 = vset.pattern.permute.xlu1 (!%p147_p3), %v1149_v0  ;;  %1123 = vset.pattern.permute.xlu0 (!%p147_p3), %v1149_v0  ;;  %p184_p4 = scmp.lt.s32.totalorder (!%p147_p3), %s1089_s13, 63 }
   0xe   : > { %s1667_s13 = smov (!%p184_p4, %s1089_s13), 63 }
   0xf   : > { %s1090_s14 = sshll.u32 %s1667_s13, 3  ;;  %s1097_s18 = smul.u32 48, %s1667_s13 }
  0x10   : > { %s1189_s17 = scalar_lea.vmem %s1659_s0, %s1090_s14 }
  0x11   : > { %v407_v1 = vld [vmem:[%s1189_s17 + $0x10] sm:$0xff]  ;;  %v405_v2 = vld [vmem:[%s1189_s17] sm:$0xff]  ;;  %v408_v3 = vld [vmem:[%s1189_s17 + $0x18] sm:$0xff]  ;;  %s1227_s21 = scalar_lea.vmem %s1660_s1, %s1097_s18  ;;  %s1241_s24 = scalar_lea.vmem %s1661_s2, %s1097_s18 }
  0x12   : > { %449 = vperm.xlu1 %1124, %v407_v1   ;;  %439 = vperm.xlu0 %1123, %v405_v2   ;;  %v406_v4 = vld [vmem:[%s1189_s17 + $0x8] sm:$0xff]  ;;  %v409_v6 = vld [vmem:[%s1189_s17 + $0x20] sm:$0xff]  ;;  %v412_v7 = vld [vmem:[%s1189_s17 + $0x38] sm:$0xff] }
  0x13   : > { %v410_v5 = vld [vmem:[%s1189_s17 + $0x28] sm:$0xff]  ;;  %v411_v8 = vld [vmem:[%s1189_s17 + $0x30] sm:$0xff]  ;;  %v413_v10 = vld [vmem:[%s1189_s17 + $0x40] sm:$0xff] }
  0x14   : > { %v414_v9 = vld [vmem:[%s1189_s17 + $0x48] sm:$0xff]  ;;  %v416_v11 = vld [vmem:[%s1189_s17 + $0x58] sm:$0xff]  ;;  %v415_v12 = vld [vmem:[%s1189_s17 + $0x50] sm:$0xff] }
  0x15   : > { %v418_v13 = vld [vmem:[%s1189_s17 + $0x68] sm:$0xff]  ;;  %v417_v14 = vld [vmem:[%s1189_s17 + $0x60] sm:$0xff]  ;;  %v420_v15 = vld [vmem:[%s1189_s17 + $0x78] sm:$0xff] }
  0x16   : > { %454 = vperm.xlu1 %1124, %v408_v3   ;;  %444 = vperm.xlu0 %1123, %v406_v4   ;;  %v419_v16 = vld [vmem:[%s1189_s17 + $0x70] sm:$0xff]  ;;  %v422_v17 = vld [vmem:[%s1189_s17 + $0x88] sm:$0xff]  ;;  %v421_v18 = vld [vmem:[%s1189_s17 + $0x80] sm:$0xff] }
  0x17   : > { %v424_v19 = vld [vmem:[%s1189_s17 + $0x98] sm:$0xff]  ;;  %v423_v20 = vld [vmem:[%s1189_s17 + $0x90] sm:$0xff]  ;;  %v426_v21 = vld [vmem:[%s1189_s17 + $0xa8] sm:$0xff] }
  0x18   : > { %v425_v22 = vld [vmem:[%s1189_s17 + $0xa0] sm:$0xff]  ;;  %v428_v23 = vld [vmem:[%s1189_s17 + $0xb8] sm:$0xff]  ;;  %v427_v24 = vld [vmem:[%s1189_s17 + $0xb0] sm:$0xff] }
  0x19   : > { %v430_v25 = vld [vmem:[%s1189_s17 + $0xc8] sm:$0xff]  ;;  %v429_v26 = vld [vmem:[%s1189_s17 + $0xc0] sm:$0xff]  ;;  %v432_v27 = vld [vmem:[%s1189_s17 + $0xd8] sm:$0xff] }
  0x1a   : > { %464 = vperm.xlu1 %1124, %v410_v5   ;;  %459 = vperm.xlu0 %1123, %v409_v6   ;;  %v431_v28 = vld [vmem:[%s1189_s17 + $0xd0] sm:$0xff]  ;;  %v434_v29 = vld [vmem:[%s1189_s17 + $0xe8] sm:$0xff]  ;;  %v433_v30 = vld [vmem:[%s1189_s17 + $0xe0] sm:$0xff] }
  0x1b   : > { %v436_v31 = vld [vmem:[%s1189_s17 + $0xf8] sm:$0xff]  ;;  %v435_v32 = vld [vmem:[%s1189_s17 + $0xf0] sm:$0xff]  ;;  %v225_v33 = vld [vmem:[%s1227_s21 + $0x60] sm:$0xff] }
  0x1c   : > { %v226_v34 = vld [vmem:[%s1227_s21 + $0x68] sm:$0xff]  ;;  %v227_v35 = vld [vmem:[%s1227_s21 + $0x70] sm:$0xff]  ;;  %v228_v36 = vld [vmem:[%s1227_s21 + $0x78] sm:$0xff] }
  0x1d   : > { %v229_v37 = vld [vmem:[%s1227_s21 + $0x80] sm:$0xff]  ;;  %v230_v38 = vld [vmem:[%s1227_s21 + $0x88] sm:$0xff]  ;;  %v215_v41 = vld [vmem:[%s1227_s21 + $0x10] sm:$0xff] }
  0x1e   : > { %474 = vperm.xlu1 %1124, %v412_v7   ;;  %469 = vperm.xlu0 %1123, %v411_v8   ;;  %v213_v39 = vld [vmem:[%s1227_s21] sm:$0xff]  ;;  %v214_v40 = vld [vmem:[%s1227_s21 + $0x8] sm:$0xff]  ;;  %v216_v43 = vld [vmem:[%s1227_s21 + $0x18] sm:$0xff] }
  0x1f   : > { %v217_v44 = vld [vmem:[%s1227_s21 + $0x20] sm:$0xff]  ;;  %v218_v45 = vld [vmem:[%s1227_s21 + $0x28] sm:$0xff]  ;;  %v231_v51 = vld [vmem:[%s1227_s21 + $0x90] sm:$0xff] }
  0x20   : > { %v232_v52 = vld [vmem:[%s1227_s21 + $0x98] sm:$0xff]  ;;  %v233_v53 = vld [vmem:[%s1227_s21 + $0xa0] sm:$0xff]  ;;  %v234_v58 = vld [vmem:[%s1227_s21 + $0xa8] sm:$0xff] }
  0x21   : > { %v235_v59 = vld [vmem:[%s1227_s21 + $0xb0] sm:$0xff]  ;;  %v236_v60 = vld [vmem:[%s1227_s21 + $0xb8] sm:$0xff]  ;;  %v221_v3 = vld [vmem:[%s1227_s21 + $0x40] sm:$0xff] }
  0x22   : > { %484 = vperm.xlu1 %1124, %v414_v9   ;;  %479 = vperm.xlu0 %1123, %v413_v10   ;;  %v219_v1 = vld [vmem:[%s1227_s21 + $0x30] sm:$0xff]  ;;  %v220_v2 = vld [vmem:[%s1227_s21 + $0x38] sm:$0xff]  ;;  %v222_v5 = vld [vmem:[%s1227_s21 + $0x48] sm:$0xff] }
  0x23   : > { %v223_v6 = vld [vmem:[%s1227_s21 + $0x50] sm:$0xff]  ;;  %v224_v7 = vld [vmem:[%s1227_s21 + $0x58] sm:$0xff] }
  0x26   : > { %494 = vperm.xlu1 %1124, %v416_v11   ;;  %489 = vperm.xlu0 %1123, %v415_v12  }
  0x2a   : > { %504 = vperm.xlu1 %1124, %v418_v13   ;;  %499 = vperm.xlu0 %1123, %v417_v14   ;;  %v243_v13 = vld [vmem:[%s1227_s21 + $0xf0] sm:$0xff]  ;;  %v244_v14 = vld [vmem:[%s1227_s21 + $0xf8] sm:$0xff] }
  0x2e   : > { %514 = vperm.xlu1 %1124, %v420_v15   ;;  %509 = vperm.xlu0 %1123, %v419_v16   ;;  %v245_v15 = vld [vmem:[%s1227_s21 + $0x100] sm:$0xff] }
  0x32   : > { %524 = vperm.xlu1 %1124, %v422_v17   ;;  %519 = vperm.xlu0 %1123, %v421_v18  }
  0x36   : > { %534 = vperm.xlu1 %1124, %v424_v19   ;;  %529 = vperm.xlu0 %1123, %v423_v20   ;;  %v246_v20 = vld [vmem:[%s1227_s21 + $0x108] sm:$0xff] }
  0x3a   : > { %544 = vperm.xlu1 %1124, %v426_v21   ;;  %539 = vperm.xlu0 %1123, %v425_v22   ;;  %v247_v21 = vld [vmem:[%s1227_s21 + $0x110] sm:$0xff]  ;;  %v248_v22 = vld [vmem:[%s1227_s21 + $0x118] sm:$0xff] }
  0x3e   : > { %554 = vperm.xlu1 %1124, %v428_v23   ;;  %549 = vperm.xlu0 %1123, %v427_v24  }
  0x42   : > { %564 = vperm.xlu1 %1124, %v430_v25   ;;  %559 = vperm.xlu0 %1123, %v429_v26  }
  0x46   : > { %574 = vperm.xlu1 %1124, %v432_v27   ;;  %569 = vperm.xlu0 %1123, %v431_v28   ;;  %v237_v27 = vld [vmem:[%s1227_s21 + $0xc0] sm:$0xff]  ;;  %v238_v28 = vld [vmem:[%s1227_s21 + $0xc8] sm:$0xff] }
  0x4a   : > { %584 = vperm.xlu1 %1124, %v434_v29   ;;  %579 = vperm.xlu0 %1123, %v433_v30   ;;  %v239_v29 = vld [vmem:[%s1227_s21 + $0xd0] sm:$0xff] }
  0x4e   : > { %594 = vperm.xlu1 %1124, %v436_v31   ;;  %589 = vperm.xlu0 %1123, %v435_v32   ;;  %v240_v31 = vld [vmem:[%s1227_s21 + $0xd8] sm:$0xff]  ;;  %v241_v32 = vld [vmem:[%s1227_s21 + $0xe0] sm:$0xff] }
  0x91   : > { %v450_v42 = vpop.permute.xlu1 %449  ;;  %v440_v46 = vpop.permute.xlu0 %439 }
  0x92   : > { %v609_v47 = vmul.f32 %v450_v42, %v225_v33  ;;  %v610_v48 = vmul.f32 %v450_v42, %v226_v34  ;;  %v611_v49 = vmul.f32 %v450_v42, %v227_v35  ;;  %v612_v50 = vmul.f32 %v450_v42, %v228_v36  ;;  %v242_v33 = vld [vmem:[%s1227_s21 + $0xe8] sm:$0xff] }
  0x93   : > { %v613_v54 = vmul.f32 %v450_v42, %v229_v37  ;;  %v614_v55 = vmul.f32 %v450_v42, %v230_v38  ;;  %v597_v56 = vmul.f32 %v440_v46, %v213_v39  ;;  %v598_v57 = vmul.f32 %v440_v46, %v214_v40  ;;  %v255_v39 = vld [vmem:[%s1227_s21 + $0x150] sm:$0xff]  ;;  %v256_v40 = vld [vmem:[%s1227_s21 + $0x158] sm:$0xff] }
  0x94   : > { %802 = vst [vmem:[%s1241_s24 + $0x60] sm:$0xff] %v609_v47  ;;  %803 = vst [vmem:[%s1241_s24 + $0x68] sm:$0xff] %v610_v48  ;;  %v599_v61 = vmul.f32 %v440_v46, %v215_v41  ;;  %v600_v62 = vmul.f32 %v440_v46, %v216_v43  ;;  %v601_v63 = vmul.f32 %v440_v46, %v217_v44  ;;  %v257_v41 = vld [vmem:[%s1227_s21 + $0x160] sm:$0xff]  ;;  %v259_v47 = vld [vmem:[%s1227_s21 + $0x170] sm:$0xff] }
  0x95   : > { %804 = vst [vmem:[%s1241_s24 + $0x70] sm:$0xff] %v611_v49  ;;  %805 = vst [vmem:[%s1241_s24 + $0x78] sm:$0xff] %v612_v50  ;;  %v602_v0 = vmul.f32 %v440_v46, %v218_v45  ;;  %v455_v4 = vpop.permute.xlu1 %454  ;;  %v445_v8 = vpop.permute.xlu0 %444  ;;  %v258_v46 = vld [vmem:[%s1227_s21 + $0x168] sm:$0xff]  ;;  %v260_v48 = vld [vmem:[%s1227_s21 + $0x178] sm:$0xff] }
  0x96   : > { %806 = vst [vmem:[%s1241_s24 + $0x80] sm:$0xff] %v613_v54  ;;  %807 = vst.msk [vmem:[%s1241_s24 + $0x88] sm:$0xff] %vm794_vm0, %v614_v55  ;;  %v615_v9 = vmul.f32 %v455_v4, %v231_v51  ;;  %v616_v10 = vmul.f32 %v455_v4, %v232_v52  ;;  %v617_v11 = vmul.f32 %v455_v4, %v233_v53  ;;  %v249_v53 = vld [vmem:[%s1227_s21 + $0x120] sm:$0xff]  ;;  %v250_v54 = vld [vmem:[%s1227_s21 + $0x128] sm:$0xff] }
  0x97   : > { %789 = vst [vmem:[%s1241_s24] sm:$0xff] %v597_v56  ;;  %790 = vst [vmem:[%s1241_s24 + $0x8] sm:$0xff] %v598_v57  ;;  %v618_v12 = vmul.f32 %v455_v4, %v234_v58  ;;  %v619_v16 = vmul.f32 %v455_v4, %v235_v59  ;;  %v620_v17 = vmul.f32 %v455_v4, %v236_v60  ;;  %v251_v55 = vld [vmem:[%s1227_s21 + $0x130] sm:$0xff]  ;;  %v252_v57 = vld [vmem:[%s1227_s21 + $0x138] sm:$0xff] }
  0x98   : > { %791 = vst [vmem:[%s1241_s24 + $0x10] sm:$0xff] %v599_v61  ;;  %792 = vst [vmem:[%s1241_s24 + $0x18] sm:$0xff] %v600_v62  ;;  %v603_v18 = vmul.f32 %v445_v8, %v219_v1  ;;  %v604_v19 = vmul.f32 %v445_v8, %v220_v2  ;;  %v605_v23 = vmul.f32 %v445_v8, %v221_v3  ;;  %v253_v58 = vld [vmem:[%s1227_s21 + $0x140] sm:$0xff]  ;;  %v254_v59 = vld [vmem:[%s1227_s21 + $0x148] sm:$0xff] }
  0x99   : > { %793 = vst [vmem:[%s1241_s24 + $0x20] sm:$0xff] %v601_v63  ;;  %795 = vst.msk [vmem:[%s1241_s24 + $0x28] sm:$0xff] %vm794_vm0, %v602_v0  ;;  %v606_v24 = vmul.f32 %v445_v8, %v222_v5  ;;  %v607_v25 = vmul.f32 %v445_v8, %v223_v6  ;;  %v608_v26 = vmul.f32 %v445_v8, %v224_v7  ;;  %v465_v30 = vpop.permute.xlu1 %464  ;;  %v460_v34 = vpop.permute.xlu0 %459  ;;  %v267_v1 = vld [vmem:[%s1227_s21 + $0x1b0] sm:$0xff]  ;;  %v268_v2 = vld [vmem:[%s1227_s21 + $0x1b8] sm:$0xff] }
  0x9a   : > { %808 = vst [vmem:[%s1241_s24 + $0x90] sm:$0xff] %v615_v9  ;;  %809 = vst [vmem:[%s1241_s24 + $0x98] sm:$0xff] %v616_v10  ;;  %v627_v35 = vmul.f32 %v465_v30, %v243_v13  ;;  %v628_v36 = vmul.f32 %v465_v30, %v244_v14  ;;  %v629_v37 = vmul.f32 %v465_v30, %v245_v15  ;;  %v269_v3 = vld [vmem:[%s1227_s21 + $0x1c0] sm:$0xff]  ;;  %v270_v8 = vld [vmem:[%s1227_s21 + $0x1c8] sm:$0xff] }
  0x9b   : > { %810 = vst [vmem:[%s1241_s24 + $0xa0] sm:$0xff] %v617_v11  ;;  %811 = vst [vmem:[%s1241_s24 + $0xa8] sm:$0xff] %v618_v12  ;;  %v630_v38 = vmul.f32 %v465_v30, %v246_v20  ;;  %v631_v42 = vmul.f32 %v465_v30, %v247_v21  ;;  %v632_v43 = vmul.f32 %v465_v30, %v248_v22  ;;  %v271_v9 = vld [vmem:[%s1227_s21 + $0x1d0] sm:$0xff]  ;;  %v272_v10 = vld [vmem:[%s1227_s21 + $0x1d8] sm:$0xff] }
  0x9c   : > { %812 = vst [vmem:[%s1241_s24 + $0xb0] sm:$0xff] %v619_v16  ;;  %813 = vst.msk [vmem:[%s1241_s24 + $0xb8] sm:$0xff] %vm794_vm0, %v620_v17  ;;  %v621_v44 = vmul.f32 %v460_v34, %v237_v27  ;;  %v622_v45 = vmul.f32 %v460_v34, %v238_v28  ;;  %v623_v49 = vmul.f32 %v460_v34, %v239_v29  ;;  %v261_v15 = vld [vmem:[%s1227_s21 + $0x180] sm:$0xff]  ;;  %v262_v16 = vld [vmem:[%s1227_s21 + $0x188] sm:$0xff] }
  0x9d   : > { %796 = vst [vmem:[%s1241_s24 + $0x30] sm:$0xff] %v603_v18  ;;  %797 = vst [vmem:[%s1241_s24 + $0x38] sm:$0xff] %v604_v19  ;;  %v624_v50 = vmul.f32 %v460_v34, %v240_v31  ;;  %v625_v51 = vmul.f32 %v460_v34, %v241_v32  ;;  %v626_v52 = vmul.f32 %v460_v34, %v242_v33  ;;  %v475_v56 = vpop.permute.xlu1 %474  ;;  %v470_v60 = vpop.permute.xlu0 %469  ;;  %v263_v17 = vld [vmem:[%s1227_s21 + $0x190] sm:$0xff]  ;;  %v264_v19 = vld [vmem:[%s1227_s21 + $0x198] sm:$0xff] }
  0x9e   : > { %798 = vst [vmem:[%s1241_s24 + $0x40] sm:$0xff] %v605_v23  ;;  %799 = vst [vmem:[%s1241_s24 + $0x48] sm:$0xff] %v606_v24  ;;  %v639_v61 = vmul.f32 %v475_v56, %v255_v39  ;;  %v640_v62 = vmul.f32 %v475_v56, %v256_v40  ;;  %v641_v63 = vmul.f32 %v475_v56, %v257_v41  ;;  %v265_v20 = vld [vmem:[%s1227_s21 + $0x1a0] sm:$0xff]  ;;  %v266_v21 = vld [vmem:[%s1227_s21 + $0x1a8] sm:$0xff] }
  0x9f   : > { %800 = vst [vmem:[%s1241_s24 + $0x50] sm:$0xff] %v607_v25  ;;  %801 = vst.msk [vmem:[%s1241_s24 + $0x58] sm:$0xff] %vm794_vm0, %v608_v26  ;;  %v642_v0 = vmul.f32 %v475_v56, %v258_v46  ;;  %v643_v4 = vmul.f32 %v475_v56, %v259_v47  ;;  %v644_v5 = vmul.f32 %v475_v56, %v260_v48  ;;  %v279_v27 = vld [vmem:[%s1227_s21 + $0x210] sm:$0xff]  ;;  %v280_v28 = vld [vmem:[%s1227_s21 + $0x218] sm:$0xff] }
  0xa0   : > { %820 = vst [vmem:[%s1241_s24 + $0xf0] sm:$0xff] %v627_v35  ;;  %821 = vst [vmem:[%s1241_s24 + $0xf8] sm:$0xff] %v628_v36  ;;  %v633_v6 = vmul.f32 %v470_v60, %v249_v53  ;;  %v634_v7 = vmul.f32 %v470_v60, %v250_v54  ;;  %v635_v11 = vmul.f32 %v470_v60, %v251_v55  ;;  %v281_v29 = vld [vmem:[%s1227_s21 + $0x220] sm:$0xff]  ;;  %v282_v34 = vld [vmem:[%s1227_s21 + $0x228] sm:$0xff] }
  0xa1   : > { %822 = vst [vmem:[%s1241_s24 + $0x100] sm:$0xff] %v629_v37  ;;  %823 = vst [vmem:[%s1241_s24 + $0x108] sm:$0xff] %v630_v38  ;;  %v636_v12 = vmul.f32 %v470_v60, %v252_v57  ;;  %v637_v13 = vmul.f32 %v470_v60, %v253_v58  ;;  %v638_v14 = vmul.f32 %v470_v60, %v254_v59  ;;  %v485_v18 = vpop.permute.xlu1 %484  ;;  %v480_v22 = vpop.permute.xlu0 %479  ;;  %v283_v35 = vld [vmem:[%s1227_s21 + $0x230] sm:$0xff]  ;;  %v284_v36 = vld [vmem:[%s1227_s21 + $0x238] sm:$0xff] }
  0xa2   : > { %824 = vst [vmem:[%s1241_s24 + $0x110] sm:$0xff] %v631_v42  ;;  %825 = vst.msk [vmem:[%s1241_s24 + $0x118] sm:$0xff] %vm794_vm0, %v632_v43  ;;  %v651_v23 = vmul.f32 %v485_v18, %v267_v1  ;;  %v652_v24 = vmul.f32 %v485_v18, %v268_v2  ;;  %v653_v25 = vmul.f32 %v485_v18, %v269_v3  ;;  %v273_v41 = vld [vmem:[%s1227_s21 + $0x1e0] sm:$0xff]  ;;  %v274_v42 = vld [vmem:[%s1227_s21 + $0x1e8] sm:$0xff] }
  0xa3   : > { %814 = vst [vmem:[%s1241_s24 + $0xc0] sm:$0xff] %v621_v44  ;;  %815 = vst [vmem:[%s1241_s24 + $0xc8] sm:$0xff] %v622_v45  ;;  %v654_v26 = vmul.f32 %v485_v18, %v270_v8  ;;  %v655_v30 = vmul.f32 %v485_v18, %v271_v9  ;;  %v656_v31 = vmul.f32 %v485_v18, %v272_v10  ;;  %v275_v43 = vld [vmem:[%s1227_s21 + $0x1f0] sm:$0xff]  ;;  %v276_v45 = vld [vmem:[%s1227_s21 + $0x1f8] sm:$0xff] }
  0xa4   : > { %816 = vst [vmem:[%s1241_s24 + $0xd0] sm:$0xff] %v623_v49  ;;  %817 = vst [vmem:[%s1241_s24 + $0xd8] sm:$0xff] %v624_v50  ;;  %v645_v32 = vmul.f32 %v480_v22, %v261_v15  ;;  %v646_v33 = vmul.f32 %v480_v22, %v262_v16  ;;  %v647_v37 = vmul.f32 %v480_v22, %v263_v17  ;;  %v277_v46 = vld [vmem:[%s1227_s21 + $0x200] sm:$0xff]  ;;  %v278_v47 = vld [vmem:[%s1227_s21 + $0x208] sm:$0xff] }
  0xa5   : > { %818 = vst [vmem:[%s1241_s24 + $0xe0] sm:$0xff] %v625_v51  ;;  %819 = vst.msk [vmem:[%s1241_s24 + $0xe8] sm:$0xff] %vm794_vm0, %v626_v52  ;;  %v648_v38 = vmul.f32 %v480_v22, %v264_v19  ;;  %v649_v39 = vmul.f32 %v480_v22, %v265_v20  ;;  %v650_v40 = vmul.f32 %v480_v22, %v266_v21  ;;  %v495_v44 = vpop.permute.xlu1 %494  ;;  %v490_v48 = vpop.permute.xlu0 %489  ;;  %v291_v53 = vld [vmem:[%s1227_s21 + $0x270] sm:$0xff]  ;;  %v292_v54 = vld [vmem:[%s1227_s21 + $0x278] sm:$0xff] }
  0xa6   : > { %832 = vst [vmem:[%s1241_s24 + $0x150] sm:$0xff] %v639_v61  ;;  %833 = vst [vmem:[%s1241_s24 + $0x158] sm:$0xff] %v640_v62  ;;  %v663_v49 = vmul.f32 %v495_v44, %v279_v27  ;;  %v664_v50 = vmul.f32 %v495_v44, %v280_v28  ;;  %v665_v51 = vmul.f32 %v495_v44, %v281_v29  ;;  %v293_v55 = vld [vmem:[%s1227_s21 + $0x280] sm:$0xff]  ;;  %v294_v60 = vld [vmem:[%s1227_s21 + $0x288] sm:$0xff] }
  0xa7   : > { %834 = vst [vmem:[%s1241_s24 + $0x160] sm:$0xff] %v641_v63  ;;  %835 = vst [vmem:[%s1241_s24 + $0x168] sm:$0xff] %v642_v0  ;;  %v666_v52 = vmul.f32 %v495_v44, %v282_v34  ;;  %v667_v56 = vmul.f32 %v495_v44, %v283_v35  ;;  %v668_v57 = vmul.f32 %v495_v44, %v284_v36  ;;  %v295_v61 = vld [vmem:[%s1227_s21 + $0x290] sm:$0xff]  ;;  %v296_v62 = vld [vmem:[%s1227_s21 + $0x298] sm:$0xff] }
  0xa8   : > { %836 = vst [vmem:[%s1241_s24 + $0x170] sm:$0xff] %v643_v4  ;;  %837 = vst.msk [vmem:[%s1241_s24 + $0x178] sm:$0xff] %vm794_vm0, %v644_v5  ;;  %v657_v58 = vmul.f32 %v490_v48, %v273_v41  ;;  %v658_v59 = vmul.f32 %v490_v48, %v274_v42  ;;  %v659_v63 = vmul.f32 %v490_v48, %v275_v43  ;;  %v285_v3 = vld [vmem:[%s1227_s21 + $0x240] sm:$0xff]  ;;  %v286_v4 = vld [vmem:[%s1227_s21 + $0x248] sm:$0xff] }
  0xa9   : > { %826 = vst [vmem:[%s1241_s24 + $0x120] sm:$0xff] %v633_v6  ;;  %827 = vst [vmem:[%s1241_s24 + $0x128] sm:$0xff] %v634_v7  ;;  %v660_v0 = vmul.f32 %v490_v48, %v276_v45  ;;  %v661_v1 = vmul.f32 %v490_v48, %v277_v46  ;;  %v662_v2 = vmul.f32 %v490_v48, %v278_v47  ;;  %v287_v5 = vld [vmem:[%s1227_s21 + $0x250] sm:$0xff]  ;;  %v505_v6 = vpop.permute.xlu1 %504  ;;  %v288_v7 = vld [vmem:[%s1227_s21 + $0x258] sm:$0xff]  ;;  %v500_v10 = vpop.permute.xlu0 %499 }
  0xaa   : > { %828 = vst [vmem:[%s1241_s24 + $0x130] sm:$0xff] %v635_v11  ;;  %829 = vst [vmem:[%s1241_s24 + $0x138] sm:$0xff] %v636_v12  ;;  %v289_v8 = vld [vmem:[%s1227_s21 + $0x260] sm:$0xff]  ;;  %v290_v9 = vld [vmem:[%s1227_s21 + $0x268] sm:$0xff]  ;;  %v675_v11 = vmul.f32 %v505_v6, %v291_v53  ;;  %v676_v12 = vmul.f32 %v505_v6, %v292_v54  ;;  %v679_v18 = vmul.f32 %v505_v6, %v295_v61 }
  0xab   : > { %830 = vst [vmem:[%s1241_s24 + $0x140] sm:$0xff] %v637_v13  ;;  %831 = vst.msk [vmem:[%s1241_s24 + $0x148] sm:$0xff] %vm794_vm0, %v638_v14  ;;  %v677_v13 = vmul.f32 %v505_v6, %v293_v55  ;;  %v678_v14 = vmul.f32 %v505_v6, %v294_v60  ;;  %v303_v15 = vld [vmem:[%s1227_s21 + $0x2d0] sm:$0xff]  ;;  %v304_v16 = vld [vmem:[%s1227_s21 + $0x2d8] sm:$0xff]  ;;  %v680_v19 = vmul.f32 %v505_v6, %v296_v62 }
  0xac   : > { %844 = vst [vmem:[%s1241_s24 + $0x1b0] sm:$0xff] %v651_v23  ;;  %845 = vst [vmem:[%s1241_s24 + $0x1b8] sm:$0xff] %v652_v24  ;;  %v305_v17 = vld [vmem:[%s1227_s21 + $0x2e0] sm:$0xff]  ;;  %v669_v20 = vmul.f32 %v500_v10, %v285_v3  ;;  %v670_v21 = vmul.f32 %v500_v10, %v286_v4  ;;  %v306_v22 = vld [vmem:[%s1227_s21 + $0x2e8] sm:$0xff]  ;;  %v673_v27 = vmul.f32 %v500_v10, %v289_v8 }
  0xad   : > { %846 = vst [vmem:[%s1241_s24 + $0x1c0] sm:$0xff] %v653_v25  ;;  %847 = vst [vmem:[%s1241_s24 + $0x1c8] sm:$0xff] %v654_v26  ;;  %v307_v23 = vld [vmem:[%s1227_s21 + $0x2f0] sm:$0xff]  ;;  %v308_v24 = vld [vmem:[%s1227_s21 + $0x2f8] sm:$0xff]  ;;  %v671_v25 = vmul.f32 %v500_v10, %v287_v5  ;;  %v672_v26 = vmul.f32 %v500_v10, %v288_v7  ;;  %v674_v28 = vmul.f32 %v500_v10, %v290_v9  ;;  %v510_v36 = vpop.permute.xlu0 %509 }
  0xae   : > { %848 = vst [vmem:[%s1241_s24 + $0x1d0] sm:$0xff] %v655_v30  ;;  %849 = vst.msk [vmem:[%s1241_s24 + $0x1d8] sm:$0xff] %vm794_vm0, %v656_v31  ;;  %v297_v29 = vld [vmem:[%s1227_s21 + $0x2a0] sm:$0xff]  ;;  %v298_v30 = vld [vmem:[%s1227_s21 + $0x2a8] sm:$0xff] }
  0xaf   : > { %838 = vst [vmem:[%s1241_s24 + $0x180] sm:$0xff] %v645_v32  ;;  %839 = vst [vmem:[%s1241_s24 + $0x188] sm:$0xff] %v646_v33  ;;  %v299_v31 = vld [vmem:[%s1227_s21 + $0x2b0] sm:$0xff]  ;;  %v515_v32 = vpop.permute.xlu1 %514  ;;  %v300_v33 = vld [vmem:[%s1227_s21 + $0x2b8] sm:$0xff]  ;;  %v681_v46 = vmul.f32 %v510_v36, %v297_v29  ;;  %v682_v47 = vmul.f32 %v510_v36, %v298_v30 }
  0xb0   : > { %840 = vst [vmem:[%s1241_s24 + $0x190] sm:$0xff] %v647_v37  ;;  %841 = vst [vmem:[%s1241_s24 + $0x198] sm:$0xff] %v648_v38  ;;  %v301_v34 = vld [vmem:[%s1227_s21 + $0x2c0] sm:$0xff]  ;;  %v302_v35 = vld [vmem:[%s1227_s21 + $0x2c8] sm:$0xff]  ;;  %v687_v37 = vmul.f32 %v515_v32, %v303_v15  ;;  %v688_v38 = vmul.f32 %v515_v32, %v304_v16  ;;  %v691_v44 = vmul.f32 %v515_v32, %v307_v23 }
  0xb1   : > { %842 = vst [vmem:[%s1241_s24 + $0x1a0] sm:$0xff] %v649_v39  ;;  %843 = vst.msk [vmem:[%s1241_s24 + $0x1a8] sm:$0xff] %vm794_vm0, %v650_v40  ;;  %v689_v39 = vmul.f32 %v515_v32, %v305_v17  ;;  %v690_v40 = vmul.f32 %v515_v32, %v306_v22  ;;  %v315_v41 = vld [vmem:[%s1227_s21 + $0x330] sm:$0xff]  ;;  %v316_v42 = vld [vmem:[%s1227_s21 + $0x338] sm:$0xff]  ;;  %v692_v45 = vmul.f32 %v515_v32, %v308_v24  ;;  %v520_v62 = vpop.permute.xlu0 %519 }
  0xb2   : > { %856 = vst [vmem:[%s1241_s24 + $0x210] sm:$0xff] %v663_v49  ;;  %857 = vst [vmem:[%s1241_s24 + $0x218] sm:$0xff] %v664_v50  ;;  %v317_v43 = vld [vmem:[%s1227_s21 + $0x340] sm:$0xff]  ;;  %v318_v48 = vld [vmem:[%s1227_s21 + $0x348] sm:$0xff]  ;;  %v685_v53 = vmul.f32 %v510_v36, %v301_v34  ;;  %v686_v54 = vmul.f32 %v510_v36, %v302_v35 }
  0xb3   : > { %858 = vst [vmem:[%s1241_s24 + $0x220] sm:$0xff] %v665_v51  ;;  %859 = vst [vmem:[%s1241_s24 + $0x228] sm:$0xff] %v666_v52  ;;  %v319_v49 = vld [vmem:[%s1227_s21 + $0x350] sm:$0xff]  ;;  %v320_v50 = vld [vmem:[%s1227_s21 + $0x358] sm:$0xff]  ;;  %v683_v51 = vmul.f32 %v510_v36, %v299_v31  ;;  %v684_v52 = vmul.f32 %v510_v36, %v300_v33 }
  0xb4   : > { %860 = vst [vmem:[%s1241_s24 + $0x230] sm:$0xff] %v667_v56  ;;  %861 = vst.msk [vmem:[%s1241_s24 + $0x238] sm:$0xff] %vm794_vm0, %v668_v57  ;;  %v309_v55 = vld [vmem:[%s1227_s21 + $0x300] sm:$0xff]  ;;  %v310_v56 = vld [vmem:[%s1227_s21 + $0x308] sm:$0xff] }
  0xb5   : > { %850 = vst [vmem:[%s1241_s24 + $0x1e0] sm:$0xff] %v657_v58  ;;  %851 = vst [vmem:[%s1241_s24 + $0x1e8] sm:$0xff] %v658_v59  ;;  %v311_v57 = vld [vmem:[%s1227_s21 + $0x310] sm:$0xff]  ;;  %v525_v58 = vpop.permute.xlu1 %524  ;;  %v312_v59 = vld [vmem:[%s1227_s21 + $0x318] sm:$0xff]  ;;  %v693_v8 = vmul.f32 %v520_v62, %v309_v55  ;;  %v694_v9 = vmul.f32 %v520_v62, %v310_v56  ;;  %v530_v24 = vpop.permute.xlu0 %529 }
  0xb6   : > { %852 = vst [vmem:[%s1241_s24 + $0x1f0] sm:$0xff] %v659_v63  ;;  %853 = vst [vmem:[%s1241_s24 + $0x1f8] sm:$0xff] %v660_v0  ;;  %v313_v60 = vld [vmem:[%s1227_s21 + $0x320] sm:$0xff]  ;;  %v314_v61 = vld [vmem:[%s1227_s21 + $0x328] sm:$0xff]  ;;  %v699_v63 = vmul.f32 %v525_v58, %v315_v41  ;;  %v700_v0 = vmul.f32 %v525_v58, %v316_v42  ;;  %v703_v6 = vmul.f32 %v525_v58, %v319_v49 }
  0xb7   : > { %854 = vst [vmem:[%s1241_s24 + $0x200] sm:$0xff] %v661_v1  ;;  %855 = vst.msk [vmem:[%s1241_s24 + $0x208] sm:$0xff] %vm794_vm0, %v662_v2  ;;  %v701_v1 = vmul.f32 %v525_v58, %v317_v43  ;;  %v702_v2 = vmul.f32 %v525_v58, %v318_v48  ;;  %v327_v3 = vld [vmem:[%s1227_s21 + $0x390] sm:$0xff]  ;;  %v328_v4 = vld [vmem:[%s1227_s21 + $0x398] sm:$0xff]  ;;  %v704_v7 = vmul.f32 %v525_v58, %v320_v50 }
  0xb8   : > { %868 = vst [vmem:[%s1241_s24 + $0x270] sm:$0xff] %v675_v11  ;;  %869 = vst [vmem:[%s1241_s24 + $0x278] sm:$0xff] %v676_v12  ;;  %v329_v5 = vld [vmem:[%s1227_s21 + $0x3a0] sm:$0xff]  ;;  %v330_v10 = vld [vmem:[%s1227_s21 + $0x3a8] sm:$0xff]  ;;  %v697_v15 = vmul.f32 %v520_v62, %v313_v60  ;;  %v698_v16 = vmul.f32 %v520_v62, %v314_v61 }
  0xb9   : > { %870 = vst [vmem:[%s1241_s24 + $0x280] sm:$0xff] %v677_v13  ;;  %871 = vst [vmem:[%s1241_s24 + $0x288] sm:$0xff] %v678_v14  ;;  %v331_v11 = vld [vmem:[%s1227_s21 + $0x3b0] sm:$0xff]  ;;  %v332_v12 = vld [vmem:[%s1227_s21 + $0x3b8] sm:$0xff]  ;;  %v695_v13 = vmul.f32 %v520_v62, %v311_v57  ;;  %v696_v14 = vmul.f32 %v520_v62, %v312_v59  ;;  %v540_v50 = vpop.permute.xlu0 %539 }
  0xba   : > { %872 = vst [vmem:[%s1241_s24 + $0x290] sm:$0xff] %v679_v18  ;;  %873 = vst.msk [vmem:[%s1241_s24 + $0x298] sm:$0xff] %vm794_vm0, %v680_v19  ;;  %v321_v17 = vld [vmem:[%s1227_s21 + $0x360] sm:$0xff]  ;;  %v322_v18 = vld [vmem:[%s1227_s21 + $0x368] sm:$0xff] }
  0xbb   : > { %862 = vst [vmem:[%s1241_s24 + $0x240] sm:$0xff] %v669_v20  ;;  %863 = vst [vmem:[%s1241_s24 + $0x248] sm:$0xff] %v670_v21  ;;  %v323_v19 = vld [vmem:[%s1227_s21 + $0x370] sm:$0xff]  ;;  %v535_v20 = vpop.permute.xlu1 %534  ;;  %v324_v21 = vld [vmem:[%s1227_s21 + $0x378] sm:$0xff]  ;;  %v705_v34 = vmul.f32 %v530_v24, %v321_v17  ;;  %v706_v35 = vmul.f32 %v530_v24, %v322_v18 }
  0xbc   : > { %864 = vst [vmem:[%s1241_s24 + $0x250] sm:$0xff] %v671_v25  ;;  %865 = vst [vmem:[%s1241_s24 + $0x258] sm:$0xff] %v672_v26  ;;  %v325_v22 = vld [vmem:[%s1227_s21 + $0x380] sm:$0xff]  ;;  %v326_v23 = vld [vmem:[%s1227_s21 + $0x388] sm:$0xff]  ;;  %v711_v25 = vmul.f32 %v535_v20, %v327_v3  ;;  %v712_v26 = vmul.f32 %v535_v20, %v328_v4  ;;  %v715_v32 = vmul.f32 %v535_v20, %v331_v11 }
  0xbd   : > { %866 = vst [vmem:[%s1241_s24 + $0x260] sm:$0xff] %v673_v27  ;;  %867 = vst.msk [vmem:[%s1241_s24 + $0x268] sm:$0xff] %vm794_vm0, %v674_v28  ;;  %v713_v27 = vmul.f32 %v535_v20, %v329_v5  ;;  %v714_v28 = vmul.f32 %v535_v20, %v330_v10  ;;  %v339_v29 = vld [vmem:[%s1227_s21 + $0x3f0] sm:$0xff]  ;;  %v340_v30 = vld [vmem:[%s1227_s21 + $0x3f8] sm:$0xff]  ;;  %v716_v33 = vmul.f32 %v535_v20, %v332_v12  ;;  %v550_v12 = vpop.permute.xlu0 %549 }
  0xbe   : > { %880 = vst [vmem:[%s1241_s24 + $0x2d0] sm:$0xff] %v687_v37  ;;  %881 = vst [vmem:[%s1241_s24 + $0x2d8] sm:$0xff] %v688_v38  ;;  %v341_v31 = vld [vmem:[%s1227_s21 + $0x400] sm:$0xff]  ;;  %v342_v36 = vld [vmem:[%s1227_s21 + $0x408] sm:$0xff]  ;;  %v709_v41 = vmul.f32 %v530_v24, %v325_v22  ;;  %v710_v42 = vmul.f32 %v530_v24, %v326_v23 }
  0xbf   : > { %882 = vst [vmem:[%s1241_s24 + $0x2e0] sm:$0xff] %v689_v39  ;;  %883 = vst [vmem:[%s1241_s24 + $0x2e8] sm:$0xff] %v690_v40  ;;  %v343_v37 = vld [vmem:[%s1227_s21 + $0x410] sm:$0xff]  ;;  %v344_v38 = vld [vmem:[%s1227_s21 + $0x418] sm:$0xff]  ;;  %v707_v39 = vmul.f32 %v530_v24, %v323_v19  ;;  %v708_v40 = vmul.f32 %v530_v24, %v324_v21 }
  0xc0   : > { %884 = vst [vmem:[%s1241_s24 + $0x2f0] sm:$0xff] %v691_v44  ;;  %885 = vst.msk [vmem:[%s1241_s24 + $0x2f8] sm:$0xff] %vm794_vm0, %v692_v45  ;;  %v333_v43 = vld [vmem:[%s1227_s21 + $0x3c0] sm:$0xff]  ;;  %v334_v44 = vld [vmem:[%s1227_s21 + $0x3c8] sm:$0xff] }
  0xc1   : > { %874 = vst [vmem:[%s1241_s24 + $0x2a0] sm:$0xff] %v681_v46  ;;  %875 = vst [vmem:[%s1241_s24 + $0x2a8] sm:$0xff] %v682_v47  ;;  %v335_v45 = vld [vmem:[%s1227_s21 + $0x3d0] sm:$0xff]  ;;  %v545_v46 = vpop.permute.xlu1 %544  ;;  %v336_v47 = vld [vmem:[%s1227_s21 + $0x3d8] sm:$0xff]  ;;  %v717_v60 = vmul.f32 %v540_v50, %v333_v43  ;;  %v718_v61 = vmul.f32 %v540_v50, %v334_v44 }
  0xc2   : > { %876 = vst [vmem:[%s1241_s24 + $0x2b0] sm:$0xff] %v683_v51  ;;  %877 = vst [vmem:[%s1241_s24 + $0x2b8] sm:$0xff] %v684_v52  ;;  %v337_v48 = vld [vmem:[%s1227_s21 + $0x3e0] sm:$0xff]  ;;  %v338_v49 = vld [vmem:[%s1227_s21 + $0x3e8] sm:$0xff]  ;;  %v723_v51 = vmul.f32 %v545_v46, %v339_v29  ;;  %v724_v52 = vmul.f32 %v545_v46, %v340_v30  ;;  %v727_v58 = vmul.f32 %v545_v46, %v343_v37 }
  0xc3   : > { %878 = vst [vmem:[%s1241_s24 + $0x2c0] sm:$0xff] %v685_v53  ;;  %879 = vst.msk [vmem:[%s1241_s24 + $0x2c8] sm:$0xff] %vm794_vm0, %v686_v54  ;;  %v725_v53 = vmul.f32 %v545_v46, %v341_v31  ;;  %v726_v54 = vmul.f32 %v545_v46, %v342_v36  ;;  %v351_v55 = vld [vmem:[%s1227_s21 + $0x450] sm:$0xff]  ;;  %v352_v56 = vld [vmem:[%s1227_s21 + $0x458] sm:$0xff]  ;;  %v728_v59 = vmul.f32 %v545_v46, %v344_v38  ;;  %v560_v38 = vpop.permute.xlu0 %559 }
  0xc4   : > { %892 = vst [vmem:[%s1241_s24 + $0x330] sm:$0xff] %v699_v63  ;;  %893 = vst [vmem:[%s1241_s24 + $0x338] sm:$0xff] %v700_v0  ;;  %v353_v57 = vld [vmem:[%s1227_s21 + $0x460] sm:$0xff]  ;;  %v354_v62 = vld [vmem:[%s1227_s21 + $0x468] sm:$0xff]  ;;  %v721_v3 = vmul.f32 %v540_v50, %v337_v48  ;;  %v722_v4 = vmul.f32 %v540_v50, %v338_v49 }
  0xc5   : > { %894 = vst [vmem:[%s1241_s24 + $0x340] sm:$0xff] %v701_v1  ;;  %895 = vst [vmem:[%s1241_s24 + $0x348] sm:$0xff] %v702_v2  ;;  %v355_v63 = vld [vmem:[%s1227_s21 + $0x470] sm:$0xff]  ;;  %v356_v0 = vld [vmem:[%s1227_s21 + $0x478] sm:$0xff]  ;;  %v719_v1 = vmul.f32 %v540_v50, %v335_v45  ;;  %v720_v2 = vmul.f32 %v540_v50, %v336_v47 }
  0xc6   : > { %896 = vst [vmem:[%s1241_s24 + $0x350] sm:$0xff] %v703_v6  ;;  %897 = vst.msk [vmem:[%s1241_s24 + $0x358] sm:$0xff] %vm794_vm0, %v704_v7  ;;  %v345_v5 = vld [vmem:[%s1227_s21 + $0x420] sm:$0xff]  ;;  %v346_v6 = vld [vmem:[%s1227_s21 + $0x428] sm:$0xff] }
  0xc7   : > { %886 = vst [vmem:[%s1241_s24 + $0x300] sm:$0xff] %v693_v8  ;;  %887 = vst [vmem:[%s1241_s24 + $0x308] sm:$0xff] %v694_v9  ;;  %v347_v7 = vld [vmem:[%s1227_s21 + $0x430] sm:$0xff]  ;;  %v555_v8 = vpop.permute.xlu1 %554  ;;  %v348_v9 = vld [vmem:[%s1227_s21 + $0x438] sm:$0xff]  ;;  %v729_v22 = vmul.f32 %v550_v12, %v345_v5  ;;  %v730_v23 = vmul.f32 %v550_v12, %v346_v6 }
  0xc8   : > { %888 = vst [vmem:[%s1241_s24 + $0x310] sm:$0xff] %v695_v13  ;;  %889 = vst [vmem:[%s1241_s24 + $0x318] sm:$0xff] %v696_v14  ;;  %v349_v10 = vld [vmem:[%s1227_s21 + $0x440] sm:$0xff]  ;;  %v350_v11 = vld [vmem:[%s1227_s21 + $0x448] sm:$0xff]  ;;  %v735_v13 = vmul.f32 %v555_v8, %v351_v55  ;;  %v736_v14 = vmul.f32 %v555_v8, %v352_v56  ;;  %v739_v20 = vmul.f32 %v555_v8, %v355_v63 }
  0xc9   : > { %890 = vst [vmem:[%s1241_s24 + $0x320] sm:$0xff] %v697_v15  ;;  %891 = vst.msk [vmem:[%s1241_s24 + $0x328] sm:$0xff] %vm794_vm0, %v698_v16  ;;  %v737_v15 = vmul.f32 %v555_v8, %v353_v57  ;;  %v738_v16 = vmul.f32 %v555_v8, %v354_v62  ;;  %v363_v17 = vld [vmem:[%s1227_s21 + $0x4b0] sm:$0xff]  ;;  %v364_v18 = vld [vmem:[%s1227_s21 + $0x4b8] sm:$0xff]  ;;  %v740_v21 = vmul.f32 %v555_v8, %v356_v0  ;;  %v570_v0 = vpop.permute.xlu0 %569 }
  0xca   : > { %904 = vst [vmem:[%s1241_s24 + $0x390] sm:$0xff] %v711_v25  ;;  %905 = vst [vmem:[%s1241_s24 + $0x398] sm:$0xff] %v712_v26  ;;  %v365_v19 = vld [vmem:[%s1227_s21 + $0x4c0] sm:$0xff]  ;;  %v366_v24 = vld [vmem:[%s1227_s21 + $0x4c8] sm:$0xff]  ;;  %v733_v29 = vmul.f32 %v550_v12, %v349_v10  ;;  %v734_v30 = vmul.f32 %v550_v12, %v350_v11 }
  0xcb   : > { %906 = vst [vmem:[%s1241_s24 + $0x3a0] sm:$0xff] %v713_v27  ;;  %907 = vst [vmem:[%s1241_s24 + $0x3a8] sm:$0xff] %v714_v28  ;;  %v367_v25 = vld [vmem:[%s1227_s21 + $0x4d0] sm:$0xff]  ;;  %v368_v26 = vld [vmem:[%s1227_s21 + $0x4d8] sm:$0xff]  ;;  %v731_v27 = vmul.f32 %v550_v12, %v347_v7  ;;  %v732_v28 = vmul.f32 %v550_v12, %v348_v9 }
  0xcc   : > { %908 = vst [vmem:[%s1241_s24 + $0x3b0] sm:$0xff] %v715_v32  ;;  %909 = vst.msk [vmem:[%s1241_s24 + $0x3b8] sm:$0xff] %vm794_vm0, %v716_v33  ;;  %v357_v31 = vld [vmem:[%s1227_s21 + $0x480] sm:$0xff]  ;;  %v358_v32 = vld [vmem:[%s1227_s21 + $0x488] sm:$0xff] }
  0xcd   : > { %898 = vst [vmem:[%s1241_s24 + $0x360] sm:$0xff] %v705_v34  ;;  %899 = vst [vmem:[%s1241_s24 + $0x368] sm:$0xff] %v706_v35  ;;  %v359_v33 = vld [vmem:[%s1227_s21 + $0x490] sm:$0xff]  ;;  %v565_v34 = vpop.permute.xlu1 %564  ;;  %v360_v35 = vld [vmem:[%s1227_s21 + $0x498] sm:$0xff]  ;;  %v741_v48 = vmul.f32 %v560_v38, %v357_v31  ;;  %v742_v49 = vmul.f32 %v560_v38, %v358_v32 }
  0xce   : > { %900 = vst [vmem:[%s1241_s24 + $0x370] sm:$0xff] %v707_v39  ;;  %901 = vst [vmem:[%s1241_s24 + $0x378] sm:$0xff] %v708_v40  ;;  %v361_v36 = vld [vmem:[%s1227_s21 + $0x4a0] sm:$0xff]  ;;  %v362_v37 = vld [vmem:[%s1227_s21 + $0x4a8] sm:$0xff]  ;;  %v747_v39 = vmul.f32 %v565_v34, %v363_v17  ;;  %v748_v40 = vmul.f32 %v565_v34, %v364_v18  ;;  %v751_v46 = vmul.f32 %v565_v34, %v367_v25 }
  0xcf   : > { %902 = vst [vmem:[%s1241_s24 + $0x380] sm:$0xff] %v709_v41  ;;  %903 = vst.msk [vmem:[%s1241_s24 + $0x388] sm:$0xff] %vm794_vm0, %v710_v42  ;;  %v749_v41 = vmul.f32 %v565_v34, %v365_v19  ;;  %v750_v42 = vmul.f32 %v565_v34, %v366_v24  ;;  %v375_v43 = vld [vmem:[%s1227_s21 + $0x510] sm:$0xff]  ;;  %v376_v44 = vld [vmem:[%s1227_s21 + $0x518] sm:$0xff]  ;;  %v752_v47 = vmul.f32 %v565_v34, %v368_v26  ;;  %v580_v26 = vpop.permute.xlu0 %579 }
  0xd0   : > { %916 = vst [vmem:[%s1241_s24 + $0x3f0] sm:$0xff] %v723_v51  ;;  %917 = vst [vmem:[%s1241_s24 + $0x3f8] sm:$0xff] %v724_v52  ;;  %v377_v45 = vld [vmem:[%s1227_s21 + $0x520] sm:$0xff]  ;;  %v378_v50 = vld [vmem:[%s1227_s21 + $0x528] sm:$0xff]  ;;  %v745_v55 = vmul.f32 %v560_v38, %v361_v36  ;;  %v746_v56 = vmul.f32 %v560_v38, %v362_v37 }
  0xd1   : > { %918 = vst [vmem:[%s1241_s24 + $0x400] sm:$0xff] %v725_v53  ;;  %919 = vst [vmem:[%s1241_s24 + $0x408] sm:$0xff] %v726_v54  ;;  %v379_v51 = vld [vmem:[%s1227_s21 + $0x530] sm:$0xff]  ;;  %v380_v52 = vld [vmem:[%s1227_s21 + $0x538] sm:$0xff]  ;;  %v743_v53 = vmul.f32 %v560_v38, %v359_v33  ;;  %v744_v54 = vmul.f32 %v560_v38, %v360_v35 }
  0xd2   : > { %920 = vst [vmem:[%s1241_s24 + $0x410] sm:$0xff] %v727_v58  ;;  %921 = vst.msk [vmem:[%s1241_s24 + $0x418] sm:$0xff] %vm794_vm0, %v728_v59  ;;  %v369_v57 = vld [vmem:[%s1227_s21 + $0x4e0] sm:$0xff]  ;;  %v370_v58 = vld [vmem:[%s1227_s21 + $0x4e8] sm:$0xff] }
  0xd3   : > { %910 = vst [vmem:[%s1241_s24 + $0x3c0] sm:$0xff] %v717_v60  ;;  %911 = vst [vmem:[%s1241_s24 + $0x3c8] sm:$0xff] %v718_v61  ;;  %v371_v59 = vld [vmem:[%s1227_s21 + $0x4f0] sm:$0xff]  ;;  %v575_v60 = vpop.permute.xlu1 %574  ;;  %v372_v61 = vld [vmem:[%s1227_s21 + $0x4f8] sm:$0xff]  ;;  %v753_v10 = vmul.f32 %v570_v0, %v369_v57  ;;  %v754_v11 = vmul.f32 %v570_v0, %v370_v58 }
  0xd4   : > { %912 = vst [vmem:[%s1241_s24 + $0x3d0] sm:$0xff] %v719_v1  ;;  %913 = vst [vmem:[%s1241_s24 + $0x3d8] sm:$0xff] %v720_v2  ;;  %v373_v62 = vld [vmem:[%s1227_s21 + $0x500] sm:$0xff]  ;;  %v374_v63 = vld [vmem:[%s1227_s21 + $0x508] sm:$0xff]  ;;  %v759_v1 = vmul.f32 %v575_v60, %v375_v43  ;;  %v760_v2 = vmul.f32 %v575_v60, %v376_v44  ;;  %v763_v8 = vmul.f32 %v575_v60, %v379_v51 }
  0xd5   : > { %914 = vst [vmem:[%s1241_s24 + $0x3e0] sm:$0xff] %v721_v3  ;;  %915 = vst.msk [vmem:[%s1241_s24 + $0x3e8] sm:$0xff] %vm794_vm0, %v722_v4  ;;  %v761_v3 = vmul.f32 %v575_v60, %v377_v45  ;;  %v762_v4 = vmul.f32 %v575_v60, %v378_v50  ;;  %v387_v5 = vld [vmem:[%s1227_s21 + $0x570] sm:$0xff]  ;;  %v388_v6 = vld [vmem:[%s1227_s21 + $0x578] sm:$0xff]  ;;  %v764_v9 = vmul.f32 %v575_v60, %v380_v52  ;;  %v590_v52 = vpop.permute.xlu0 %589 }
  0xd6   : > { %928 = vst [vmem:[%s1241_s24 + $0x450] sm:$0xff] %v735_v13  ;;  %929 = vst [vmem:[%s1241_s24 + $0x458] sm:$0xff] %v736_v14  ;;  %v389_v7 = vld [vmem:[%s1227_s21 + $0x580] sm:$0xff]  ;;  %v390_v12 = vld [vmem:[%s1227_s21 + $0x588] sm:$0xff]  ;;  %v757_v17 = vmul.f32 %v570_v0, %v373_v62  ;;  %v758_v18 = vmul.f32 %v570_v0, %v374_v63 }
  0xd7   : > { %930 = vst [vmem:[%s1241_s24 + $0x460] sm:$0xff] %v737_v15  ;;  %931 = vst [vmem:[%s1241_s24 + $0x468] sm:$0xff] %v738_v16  ;;  %v391_v13 = vld [vmem:[%s1227_s21 + $0x590] sm:$0xff]  ;;  %v392_v14 = vld [vmem:[%s1227_s21 + $0x598] sm:$0xff]  ;;  %v755_v15 = vmul.f32 %v570_v0, %v371_v59  ;;  %v756_v16 = vmul.f32 %v570_v0, %v372_v61 }
  0xd8   : > { %932 = vst [vmem:[%s1241_s24 + $0x470] sm:$0xff] %v739_v20  ;;  %933 = vst.msk [vmem:[%s1241_s24 + $0x478] sm:$0xff] %vm794_vm0, %v740_v21  ;;  %v381_v19 = vld [vmem:[%s1227_s21 + $0x540] sm:$0xff]  ;;  %v382_v20 = vld [vmem:[%s1227_s21 + $0x548] sm:$0xff] }
  0xd9   : > { %922 = vst [vmem:[%s1241_s24 + $0x420] sm:$0xff] %v729_v22  ;;  %923 = vst [vmem:[%s1241_s24 + $0x428] sm:$0xff] %v730_v23  ;;  %v383_v21 = vld [vmem:[%s1227_s21 + $0x550] sm:$0xff]  ;;  %v585_v22 = vpop.permute.xlu1 %584  ;;  %v384_v23 = vld [vmem:[%s1227_s21 + $0x558] sm:$0xff]  ;;  %v765_v36 = vmul.f32 %v580_v26, %v381_v19  ;;  %v766_v37 = vmul.f32 %v580_v26, %v382_v20 }
  0xda   : > { %924 = vst [vmem:[%s1241_s24 + $0x430] sm:$0xff] %v731_v27  ;;  %925 = vst [vmem:[%s1241_s24 + $0x438] sm:$0xff] %v732_v28  ;;  %v385_v24 = vld [vmem:[%s1227_s21 + $0x560] sm:$0xff]  ;;  %v386_v25 = vld [vmem:[%s1227_s21 + $0x568] sm:$0xff]  ;;  %v771_v27 = vmul.f32 %v585_v22, %v387_v5  ;;  %v772_v28 = vmul.f32 %v585_v22, %v388_v6  ;;  %v775_v34 = vmul.f32 %v585_v22, %v391_v13 }
  0xdb   : > { %926 = vst [vmem:[%s1241_s24 + $0x440] sm:$0xff] %v733_v29  ;;  %927 = vst.msk [vmem:[%s1241_s24 + $0x448] sm:$0xff] %vm794_vm0, %v734_v30  ;;  %v773_v29 = vmul.f32 %v585_v22, %v389_v7  ;;  %v774_v30 = vmul.f32 %v585_v22, %v390_v12  ;;  %v399_v31 = vld [vmem:[%s1227_s21 + $0x5d0] sm:$0xff]  ;;  %v400_v32 = vld [vmem:[%s1227_s21 + $0x5d8] sm:$0xff]  ;;  %v776_v35 = vmul.f32 %v585_v22, %v392_v14 }
  0xdc   : > { %940 = vst [vmem:[%s1241_s24 + $0x4b0] sm:$0xff] %v747_v39  ;;  %941 = vst [vmem:[%s1241_s24 + $0x4b8] sm:$0xff] %v748_v40  ;;  %v401_v33 = vld [vmem:[%s1227_s21 + $0x5e0] sm:$0xff]  ;;  %v402_v38 = vld [vmem:[%s1227_s21 + $0x5e8] sm:$0xff]  ;;  %v769_v43 = vmul.f32 %v580_v26, %v385_v24  ;;  %v770_v44 = vmul.f32 %v580_v26, %v386_v25 }
  0xdd   : > { %942 = vst [vmem:[%s1241_s24 + $0x4c0] sm:$0xff] %v749_v41  ;;  %943 = vst [vmem:[%s1241_s24 + $0x4c8] sm:$0xff] %v750_v42  ;;  %v403_v39 = vld [vmem:[%s1227_s21 + $0x5f0] sm:$0xff]  ;;  %v404_v40 = vld [vmem:[%s1227_s21 + $0x5f8] sm:$0xff]  ;;  %v767_v41 = vmul.f32 %v580_v26, %v383_v21  ;;  %v768_v42 = vmul.f32 %v580_v26, %v384_v23 }
  0xde   : > { %944 = vst [vmem:[%s1241_s24 + $0x4d0] sm:$0xff] %v751_v46  ;;  %945 = vst.msk [vmem:[%s1241_s24 + $0x4d8] sm:$0xff] %vm794_vm0, %v752_v47  ;;  %v393_v45 = vld [vmem:[%s1227_s21 + $0x5a0] sm:$0xff]  ;;  %v394_v46 = vld [vmem:[%s1227_s21 + $0x5a8] sm:$0xff] }
  0xdf   : > { %934 = vst [vmem:[%s1241_s24 + $0x480] sm:$0xff] %v741_v48  ;;  %935 = vst [vmem:[%s1241_s24 + $0x488] sm:$0xff] %v742_v49  ;;  %v395_v47 = vld [vmem:[%s1227_s21 + $0x5b0] sm:$0xff]  ;;  %v595_v48 = vpop.permute.xlu1 %594  ;;  %v396_v49 = vld [vmem:[%s1227_s21 + $0x5b8] sm:$0xff]  ;;  %v777_v59 = vmul.f32 %v590_v52, %v393_v45  ;;  %v778_v60 = vmul.f32 %v590_v52, %v394_v46 }
  0xe0   : > { %936 = vst [vmem:[%s1241_s24 + $0x490] sm:$0xff] %v743_v53  ;;  %937 = vst [vmem:[%s1241_s24 + $0x498] sm:$0xff] %v744_v54  ;;  %v397_v50 = vld [vmem:[%s1227_s21 + $0x5c0] sm:$0xff]  ;;  %v398_v51 = vld [vmem:[%s1227_s21 + $0x5c8] sm:$0xff]  ;;  %v783_v53 = vmul.f32 %v595_v48, %v399_v31  ;;  %v784_v54 = vmul.f32 %v595_v48, %v400_v32  ;;  %v787_v57 = vmul.f32 %v595_v48, %v403_v39 }
  0xe1   : > { %938 = vst [vmem:[%s1241_s24 + $0x4a0] sm:$0xff] %v745_v55  ;;  %939 = vst.msk [vmem:[%s1241_s24 + $0x4a8] sm:$0xff] %vm794_vm0, %v746_v56  ;;  %v785_v55 = vmul.f32 %v595_v48, %v401_v33  ;;  %v786_v56 = vmul.f32 %v595_v48, %v402_v38  ;;  %v788_v58 = vmul.f32 %v595_v48, %v404_v40 }
  0xe2   : > { %952 = vst [vmem:[%s1241_s24 + $0x510] sm:$0xff] %v759_v1  ;;  %953 = vst [vmem:[%s1241_s24 + $0x518] sm:$0xff] %v760_v2  ;;  %v779_v61 = vmul.f32 %v590_v52, %v395_v47  ;;  %v780_v62 = vmul.f32 %v590_v52, %v396_v49  ;;  %v781_v63 = vmul.f32 %v590_v52, %v397_v50 }
  0xe3   : > { %954 = vst [vmem:[%s1241_s24 + $0x520] sm:$0xff] %v761_v3  ;;  %955 = vst [vmem:[%s1241_s24 + $0x528] sm:$0xff] %v762_v4  ;;  %v782_v0 = vmul.f32 %v590_v52, %v398_v51 }
  0xe4   : > { %956 = vst [vmem:[%s1241_s24 + $0x530] sm:$0xff] %v763_v8  ;;  %957 = vst.msk [vmem:[%s1241_s24 + $0x538] sm:$0xff] %vm794_vm0, %v764_v9 }
  0xe5   : > { %946 = vst [vmem:[%s1241_s24 + $0x4e0] sm:$0xff] %v753_v10  ;;  %947 = vst [vmem:[%s1241_s24 + $0x4e8] sm:$0xff] %v754_v11 }
  0xe6   : > { %948 = vst [vmem:[%s1241_s24 + $0x4f0] sm:$0xff] %v755_v15  ;;  %949 = vst [vmem:[%s1241_s24 + $0x4f8] sm:$0xff] %v756_v16 }
  0xe7   : > { %950 = vst [vmem:[%s1241_s24 + $0x500] sm:$0xff] %v757_v17  ;;  %951 = vst.msk [vmem:[%s1241_s24 + $0x508] sm:$0xff] %vm794_vm0, %v758_v18 }
  0xe8   : > { %964 = vst [vmem:[%s1241_s24 + $0x570] sm:$0xff] %v771_v27  ;;  %965 = vst [vmem:[%s1241_s24 + $0x578] sm:$0xff] %v772_v28 }
  0xe9   : > { %966 = vst [vmem:[%s1241_s24 + $0x580] sm:$0xff] %v773_v29  ;;  %967 = vst [vmem:[%s1241_s24 + $0x588] sm:$0xff] %v774_v30 }
  0xea   : > { %968 = vst [vmem:[%s1241_s24 + $0x590] sm:$0xff] %v775_v34  ;;  %969 = vst.msk [vmem:[%s1241_s24 + $0x598] sm:$0xff] %vm794_vm0, %v776_v35 }
  0xeb   : > { %958 = vst [vmem:[%s1241_s24 + $0x540] sm:$0xff] %v765_v36  ;;  %959 = vst [vmem:[%s1241_s24 + $0x548] sm:$0xff] %v766_v37 }
  0xec   : > { %960 = vst [vmem:[%s1241_s24 + $0x550] sm:$0xff] %v767_v41  ;;  %961 = vst [vmem:[%s1241_s24 + $0x558] sm:$0xff] %v768_v42 }
  0xed   : > { %962 = vst [vmem:[%s1241_s24 + $0x560] sm:$0xff] %v769_v43  ;;  %963 = vst.msk [vmem:[%s1241_s24 + $0x568] sm:$0xff] %vm794_vm0, %v770_v44 }
  0xee   : > { %976 = vst [vmem:[%s1241_s24 + $0x5d0] sm:$0xff] %v783_v53  ;;  %977 = vst [vmem:[%s1241_s24 + $0x5d8] sm:$0xff] %v784_v54 }
  0xef   : > { %978 = vst [vmem:[%s1241_s24 + $0x5e0] sm:$0xff] %v785_v55  ;;  %979 = vst [vmem:[%s1241_s24 + $0x5e8] sm:$0xff] %v786_v56 }
  0xf0   : > { %980 = vst [vmem:[%s1241_s24 + $0x5f0] sm:$0xff] %v787_v57  ;;  %981 = vst.msk [vmem:[%s1241_s24 + $0x5f8] sm:$0xff] %vm794_vm0, %v788_v58 }
  0xf1   : > { %970 = vst [vmem:[%s1241_s24 + $0x5a0] sm:$0xff] %v777_v59  ;;  %971 = vst [vmem:[%s1241_s24 + $0x5a8] sm:$0xff] %v778_v60 }
  0xf2   : > { %972 = vst [vmem:[%s1241_s24 + $0x5b0] sm:$0xff] %v779_v61  ;;  %973 = vst [vmem:[%s1241_s24 + $0x5b8] sm:$0xff] %v780_v62 }
  0xf3   : > { %974 = vst [vmem:[%s1241_s24 + $0x5c0] sm:$0xff] %v781_v63  ;;  %975 = vst.msk [vmem:[%s1241_s24 + $0x5c8] sm:$0xff] %vm794_vm0, %v782_v0 }
  0xf4 PF: > { %s12_s11 = sadd.s32 1, %s1147_s11   ;;  %s1662_s9 = smov %s1143_s10 }
  0xf5   : > { %p9_p5 = scmp.ge.s32.totalorder %s12_s11, 4   ;;  %s1663_s10 = smov %s1665_s12 }
  0xf7   :  { %11 = sbr.rel (!%p9_p5) target bundleno = 2 (0x2), region = 61 }

</bundles_post_ra>
